<compile_context>
chip_gen: v6e
topology: v6e:2x2x1
jax: 0.10.0
libtpu: 0.0.40
codegen_flags: <defaults>
</compile_context>

<pallas_src>
import functools

import jax
import jax.numpy as jnp
from jax.experimental import pallas as pl
from jax.experimental.pallas import tpu as pltpu


def _linear_softmax_kernel(x_ref, w_ref, b_ref, o_ref, acc_ref, *, valid_cols):
    k = pl.program_id(1)

    @pl.when(k == 0)
    def _():
        acc_ref[...] = jnp.zeros_like(acc_ref)

    # Cast x to bf16 inside the kernel: the DMA moves x once in its native
    # dtype and the cast hides under the software pipeline (VPU slot).
    x = x_ref[...].astype(jnp.bfloat16)
    acc_ref[...] += jnp.dot(x, w_ref[...], preferred_element_type=jnp.float32)

    @pl.when(k == pl.num_programs(1) - 1)
    def _():
        # Bias stays f32: padded feature columns carry a -1e30 bias so their
        # exp() underflows to 0 and they never pollute the softmax denominator.
        logits = acc_ref[...] + b_ref[...]
        m = jnp.max(logits, axis=1, keepdims=True)
        e = jnp.exp(logits - m)
        denom = jnp.sum(e, axis=1, keepdims=True)
        probs = e * pl.reciprocal(denom, approx=True)
        # Write only the real feature columns: no padded-f32 output + slice.
        o_ref[...] = probs[:, :valid_cols].astype(o_ref.dtype)


def prepare_params(w, b):
    """One-time (init-time) parameter prep — hoisted out of the forward hot path.

    Pads the feature axis of W / b to a multiple of 128 lanes and casts W to
    bf16 for the MXU. Padded bias columns get -1e30 (softmax mask). The bias
    is kept in f32 so real bias values keep full precision.
    Returns (w_prepared, b_prepared, output_dim).
    """
    input_dim, output_dim = w.shape
    assert b.shape == (1, output_dim)
    n_pad = ((output_dim + 127) // 128) * 128
    if n_pad != output_dim:
        w = jnp.pad(w, ((0, 0), (0, n_pad - output_dim)))
        b = jnp.pad(b, ((0, 0), (0, n_pad - output_dim)), constant_values=-1e30)
    return w.astype(jnp.bfloat16), b.astype(jnp.float32), output_dim


def linear_regressor_forward(x, w_prepared, b_prepared, output_dim, *, block_b=1024):
    """Pallas equivalent of nn.Sequential(nn.Linear(in, out), nn.Softmax(dim=1)).

    x: (B, input_dim) (any float dtype, cast to bf16 in-kernel for the MXU);
    w_prepared/b_prepared/output_dim: from prepare_params().
    Returns (B, output_dim) in x.dtype.
    """
    B, input_dim = x.shape
    k_dim, n_pad = w_prepared.shape
    assert k_dim == input_dim
    assert b_prepared.shape == (1, n_pad)
    assert b_prepared.dtype == jnp.float32  # -1e30 sentinel + bias precision
    assert output_dim <= n_pad
    out_dtype = x.dtype

    x_item = jnp.dtype(x.dtype).itemsize
    w_item = jnp.dtype(w_prepared.dtype).itemsize
    out_item = jnp.dtype(out_dtype).itemsize

    # ---- Generation-aware VMEM budget (v5e/v6e: 128 MiB, v7x: 64 MiB/TC). ----
    try:
        vmem_capacity = int(pltpu.get_tpu_info().vmem_capacity_bytes)
    except Exception:
        vmem_capacity = 64 * 1024 * 1024  # conservative fallback (v7x-sized)
    vmem_budget = int(vmem_capacity * 0.70)

    # ---- K (reduction) tiling: single block for small/medium input_dim, else
    #      a 128-aligned divisor so the per-step weight slab stays bounded. ----
    tk = input_dim
    if input_dim > 2048 and (2 * input_dim * n_pad * w_item) > vmem_budget // 4:
        for cand in (2048, 1024, 512, 256, 128):
            if input_dim % cand == 0:
                tk = cand
                break
        # TODO(synk): pad K at prepare_params time when input_dim has no
        # 128-aligned divisor so prime-ish huge input_dims also get K-tiled.
    grid_k = input_dim // tk

    def vmem_estimate(tb_):
        xb = 2 * tb_ * tk * x_item            # x block (native dtype), 2-buffered
        wb = 2 * tk * n_pad * w_item          # bf16 W block, 2-buffered
        bb = 2 * n_pad * 4                    # f32 bias block
        ob = 2 * tb_ * output_dim * out_item  # unpadded output block
        accb = tb_ * n_pad * 4                # f32 accumulator scratch
        return xb + wb + bb + ob + accb

    # ---- Batch tiling, rounded to 16 rows (bf16 (16,128) sublane packing). ----
    tb = min(block_b, B)
    if tb < B:
        tb = max(16, (tb // 16) * 16)
    while tb > 16 and vmem_estimate(tb) > vmem_budget:
        tb = max(16, ((tb // 2) // 16) * 16)
    grid_b = pl.cdiv(B, tb)

    vmem_limit = max(vmem_estimate(tb) + (8 << 20), 16 << 20)
    vmem_limit = int(min(vmem_limit, int(vmem_capacity * 0.85)))

    kernel = functools.partial(_linear_softmax_kernel, valid_cols=output_dim)

    return pl.pallas_call(
        kernel,
        out_shape=jax.ShapeDtypeStruct((B, output_dim), out_dtype),
        grid_spec=pltpu.PrefetchScalarGridSpec(
            num_scalar_prefetch=0,
            grid=(grid_b, grid_k),
            in_specs=[
                pl.BlockSpec((tb, tk), lambda i, k: (i, k)),
                # Constant over the batch axis: stays VMEM-resident across i.
                pl.BlockSpec((tk, n_pad), lambda i, k: (k, 0)),
                pl.BlockSpec((1, n_pad), lambda i, k: (0, 0)),
            ],
            out_specs=pl.BlockSpec((tb, output_dim), lambda i, k: (i, 0)),
            scratch_shapes=[pltpu.VMEM((tb, n_pad), jnp.float32)],
        ),
        compiler_params=pltpu.CompilerParams(
            # Batch tiles are independent -> eligible for v7x megacore sharding.
            # TODO(synk): verify the core split on v7x; switch to CORE_PARALLEL
            # or an explicit leading core axis if both TCs are not engaged.
            dimension_semantics=("parallel", "arbitrary"),
            vmem_limit_bytes=vmem_limit,
        ),
        cost_estimate=pl.CostEstimate(
            flops=2 * B * input_dim * n_pad + 5 * B * n_pad,
            transcendentals=B * n_pad,
            bytes_accessed=(B * input_dim * x_item
                            + input_dim * n_pad * w_item
                            + n_pad * 4
                            + B * output_dim * out_item),
        ),
    )(x, w_prepared, b_prepared)


if __name__ == "__main__":
    # Small shapes consistent with the module: batch=8, input_dim=32, output_dim=16.
    B, input_dim, output_dim = 8, 32, 16

    key = jax.random.PRNGKey(0)
    kx, kw, kb = jax.random.split(key, 3)

    x = jax.random.normal(kx, (B, input_dim), dtype=jnp.float32)

    # Deterministic init mimicking nn.Linear's uniform(-1/sqrt(in), 1/sqrt(in)).
    bound = 1.0 / jnp.sqrt(jnp.float32(input_dim))
    # PyTorch weight is (output_dim, input_dim); store its transpose for x @ W.
    w = jax.random.uniform(kw, (input_dim, output_dim), dtype=jnp.float32,
                           minval=-bound, maxval=bound)
    b = jax.random.uniform(kb, (1, output_dim), dtype=jnp.float32,
                           minval=-bound, maxval=bound)

    # Parameter prep happens ONCE (init time), not in the forward hot path.
    w_p, b_p, out_dim = prepare_params(w, b)

    out = linear_regressor_forward(x, w_p, b_p, out_dim)
    out = jax.block_until_ready(out)
    assert out.shape == (B, output_dim)

    # Reference 1: same bf16-input matmul (f32 accumulate), f32 softmax — tight check.
    logits_ref = jnp.dot(x.astype(jnp.bfloat16), w.astype(jnp.bfloat16),
                         preferred_element_type=jnp.float32) + b
    ref_bf16 = jax.nn.softmax(logits_ref, axis=1)
    # Tolerance covers the approx-reciprocal (~2^-12 relative) and op reordering.
    assert jnp.allclose(out, ref_bf16, atol=2e-3, rtol=2e-3), \
        float(jnp.max(jnp.abs(out - ref_bf16)))

    # Reference 2: pure-f32 module semantics — looser check (bf16 matmul rounding).
    ref_f32 = jax.nn.softmax(x @ w + b, axis=1)
    assert jnp.allclose(out, ref_f32, atol=2e-2, rtol=2e-2)

    # Rows sum to 1 (up to approx-reciprocal error).
    assert jnp.allclose(jnp.sum(out, axis=1), 1.0, atol=2e-3)

    print("KERNEL_OK")
</pallas_src>

<mosaic_0001>
module attributes {stable_mosaic.version = 11 : i64} {
  func.func @_linear_softmax_kernel(%arg0: i32, %arg1: i32, %arg2: memref<8x32xf32, #tpu.memory_space<vmem>>, %arg3: memref<32x128xbf16, #tpu.memory_space<vmem>>, %arg4: memref<1x128xf32, #tpu.memory_space<vmem>>, %arg5: memref<8x16xf32, #tpu.memory_space<vmem>>, %arg6: memref<8x128xf32, #tpu.memory_space<vmem>>) attributes {dimension_semantics = [#tpu.dimension_semantics<parallel>, #tpu.dimension_semantics<arbitrary>], iteration_bounds = array<i64: 1, 1>, scalar_prefetch = 0 : i64, scratch_operands = 1 : i64, tpu.core_type = #tpu.core_type<tc>, window_params = [{transform_indices = @transform_0, window_bounds = array<i64: 8, 32>}, {transform_indices = @transform_1, window_bounds = array<i64: 32, 128>}, {pipeline_mode = #tpu.pipeline_mode<synchronous>, transform_indices = @transform_2, window_bounds = array<i64: 1, 128>}, {transform_indices = @transform_3, window_bounds = array<i64: 8, 16>}]} {
    %c0_i32 = arith.constant 0 : i32
    %0 = arith.cmpi eq, %arg1, %c0_i32 : i32
    %1 = arith.extui %0 : i1 to i32
    %c0_i32_0 = arith.constant 0 : i32
    %2 = arith.cmpi ne, %1, %c0_i32_0 : i32
    scf.if %2 {
      %cst_10 = arith.constant 0.000000e+00 : f32
      %13 = vector.broadcast %cst_10 : f32 to vector<8x128xf32>
      %c0_11 = arith.constant 0 : index
      %c0_12 = arith.constant 0 : index
      %14 = vector.load %arg6[%c0_11, %c0_12] : memref<8x128xf32, #tpu.memory_space<vmem>>, vector<8x128xf32>
      tpu.vector_store %arg6[%c0_11, %c0_12], %13 {strides = array<i32>} : memref<8x128xf32, #tpu.memory_space<vmem>>, vector<8x128xf32>,
    } else {
    }
    %c0 = arith.constant 0 : index
    %c0_1 = arith.constant 0 : index
    %3 = vector.load %arg2[%c0, %c0_1] : memref<8x32xf32, #tpu.memory_space<vmem>>, vector<8x32xf32>
    %4 = arith.truncf %3 : vector<8x32xf32> to vector<8x32xbf16>
    %c0_2 = arith.constant 0 : index
    %c0_3 = arith.constant 0 : index
    %5 = vector.load %arg6[%c0_2, %c0_3] : memref<8x128xf32, #tpu.memory_space<vmem>>, vector<8x128xf32>
    %c0_4 = arith.constant 0 : index
    %c0_5 = arith.constant 0 : index
    %6 = vector.load %arg3[%c0_4, %c0_5] : memref<32x128xbf16, #tpu.memory_space<vmem>>, vector<32x128xbf16>
    %cst = arith.constant dense<0.000000e+00> : vector<8x128xf32>
    %7 = tpu.matmul %4, %6, %cst {dimension_numbers = #tpu.dot_dimension_numbers<[1], [0], [0], [1], [0, 0, 1, 1], [], []>} : vector<8x32xbf16>, vector<32x128xbf16>, vector<8x128xf32> -> vector<8x128xf32>
    %8 = arith.addf %5, %7 : vector<8x128xf32>
    %c0_6 = arith.constant 0 : index
    %c0_7 = arith.constant 0 : index
    %9 = vector.load %arg6[%c0_6, %c0_7] : memref<8x128xf32, #tpu.memory_space<vmem>>, vector<8x128xf32>
    tpu.vector_store %arg6[%c0_6, %c0_7], %8 {strides = array<i32>} : memref<8x128xf32, #tpu.memory_space<vmem>>, vector<8x128xf32>,
    %c0_i32_8 = arith.constant 0 : i32
    %10 = arith.cmpi eq, %arg1, %c0_i32_8 : i32
    %11 = arith.extui %10 : i1 to i32
    %c0_i32_9 = arith.constant 0 : i32
    %12 = arith.cmpi ne, %11, %c0_i32_9 : i32
    scf.if %12 {
      %c0_10 = arith.constant 0 : index
      %c0_11 = arith.constant 0 : index
      %13 = vector.load %arg6[%c0_10, %c0_11] : memref<8x128xf32, #tpu.memory_space<vmem>>, vector<8x128xf32>
      %c0_12 = arith.constant 0 : index
      %c0_13 = arith.constant 0 : index
      %14 = vector.load %arg4[%c0_12, %c0_13] : memref<1x128xf32, #tpu.memory_space<vmem>>, vector<1x128xf32>
      %15 = vector.broadcast %14 : vector<1x128xf32> to vector<8x128xf32>
      %16 = arith.addf %13, %15 : vector<8x128xf32>
      %cst_14 = arith.constant dense<0xFF800000> : vector<8xf32>
      %17 = vector.multi_reduction <maximumf>, %16, %cst_14 [1] : vector<8x128xf32> to vector<8xf32>
      %18 = vector.shape_cast %17 : vector<8xf32> to vector<8x1xf32>
      %19 = vector.broadcast %18 : vector<8x1xf32> to vector<8x128xf32>
      %20 = arith.subf %16, %19 : vector<8x128xf32>
      %21 = math.exp %20 : vector<8x128xf32>
      %cst_15 = arith.constant dense<0.000000e+00> : vector<8xf32>
      %22 = vector.multi_reduction <add>, %21, %cst_15 [1] : vector<8x128xf32> to vector<8xf32>
      %23 = vector.shape_cast %22 : vector<8xf32> to vector<8x1xf32>
      %24 = tpu.reciprocal %23 {approx = true} : vector<8x1xf32> -> vector<8x1xf32>
      %25 = vector.broadcast %24 : vector<8x1xf32> to vector<8x128xf32>
      %26 = arith.mulf %21, %25 : vector<8x128xf32>
      %27 = vector.extract_strided_slice %26 {offsets = [0, 0], sizes = [8, 16], strides = [1, 1]} : vector<8x128xf32> to vector<8x16xf32>
      %c0_16 = arith.constant 0 : index
      %c0_17 = arith.constant 0 : index
      %28 = vector.load %arg5[%c0_16, %c0_17] : memref<8x16xf32, #tpu.memory_space<vmem>>, vector<8x16xf32>
      tpu.vector_store %arg5[%c0_16, %c0_17], %27 {strides = array<i32>} : memref<8x16xf32, #tpu.memory_space<vmem>>, vector<8x16xf32>,
    } else {
    }
    return
  }
  func.func @transform_0(%arg0: i32, %arg1: i32) -> (i32, i32) {
    %c0_i32 = arith.constant 0 : i32
    return %arg0, %arg1 : i32, i32
  }
  func.func @transform_1(%arg0: i32, %arg1: i32) -> (i32, i32) {
    %c0_i32 = arith.constant 0 : i32
    %c0_i32_0 = arith.constant 0 : i32
    return %arg1, %c0_i32 : i32, i32
  }
  func.func @transform_2(%arg0: i32, %arg1: i32) -> (i32, i32) {
    %c0_i32 = arith.constant 0 : i32
    %c0_i32_0 = arith.constant 0 : i32
    %c0_i32_1 = arith.constant 0 : i32
    return %c0_i32, %c0_i32_0 : i32, i32
  }
  func.func @transform_3(%arg0: i32, %arg1: i32) -> (i32, i32) {
    %c0_i32 = arith.constant 0 : i32
    %c0_i32_0 = arith.constant 0 : i32
    return %arg0, %c0_i32 : i32, i32
  }
}

</mosaic_0001>

<bundles_post_ra>
// kernel: tpu_custom_call.1
= control target key start
LH: loop header
LB: loop body
LE: loop exit
PB: predicated region body
PF: predicated region fallthrough
CT: control target
= control target key end

     0   :  { %8 = vsyncpa [#allocation4], 0  ;;  %s284_s0 = inlined_call_operand.hbm [shape: f32[8,32], index: 0, kind: input, shape index: {}]   ;;  %s285_s1 = inlined_call_operand.hbm [shape: bf16[32,128], index: 1, kind: input, shape index: {}]   ;;  %s286_s2 = inlined_call_operand.vmem [shape: f32[1,128], index: 2, kind: input, shape index: {}]   ;;  %s287_s3 = inlined_call_operand.hbm [shape: f32[8,16], index: 3, kind: output, shape index: {}]  }
   0x1   :  { %9 = vsyncpa [#allocation7], 0 }
   0x2   :  { %10 = vsyncpa [#allocation5], 0  ;;  %s245_s12 = smov [#allocation3]   ;;  %s246_s14 = smov [#allocation6]  }
   0x3   :  { %s17_s13 = sshll.u32 %s245_s12, 4  ;;  %s26_s15 = sshll.u32 %s246_s14, 4  ;;  %s18_s13 = int_to_ptr.vmem [resolvable:$true] %s17_s13  ;;  %s27_s15 = int_to_ptr.vmem [resolvable:$true] %s26_s15 }
   0x4   :  { %s187_s16 = scalar_lea.vmem %s18_s13, 128  ;;  %p192_p1 = scmp.lt.s32.totalorder %s18_s13, %s18_s13 }
   0x5   :  { %p188_p0 = scmp.ne.s32.totalorder %s18_s13, %s187_s16  ;;  %p193_p2 = scmp.lt.s32.totalorder %s187_s16, %s187_s16 }
   0x7   :  { %p194_p3 = por %p193_p2, %p192_p1 }
   0x9   :  { %p195_p4 = pnand %p194_p3, %p188_p0 }
   0xb   :  { %198 = shalt.err (!%p195_p4)
}
   0xc   :  { %20 = dma.hbm_to_vmem [thread:$0]  %s284_s0, 128, %s18_s13, [#allocation4]  }
   0xd   :  { %s207_s19 = scalar_lea.vmem %s27_s15, 256  ;;  %p212_p6 = scmp.lt.s32.totalorder %s27_s15, %s27_s15 }
   0xe   :  { %p208_p5 = scmp.ne.s32.totalorder %s27_s15, %s207_s19  ;;  %p213_p7 = scmp.lt.s32.totalorder %s207_s19, %s207_s19 }
  0x10   :  { %p214_p8 = por %p213_p7, %p212_p6 }
  0x12   :  { %p215_p9 = pnand %p214_p8, %p208_p5 }
  0x14   :  { %218 = shalt.err (!%p215_p9)
}
  0x15   :  { %s247_s20 = smov 64   ;;  %s248_s21 = smov 4  }
  0x16   :  { %32 = dma.hbm_to_vmem [thread:$0]  %s285_s1, 256, %s27_s15, [#allocation7], %s247_s20, %s247_s20, %s248_s21  }
  0x17   :  { %239 = dma.done.wait [#allocation4], 128  }
  0x18   :  { %240 = vsyncadd [#allocation4], 4294967168 }
  0x19   :  { %241 = dma.done.wait [#allocation7], 256  }
  0x1a   :  { %242 = vsyncadd [#allocation7], 4294967040  ;;  %v249_v0 = vmov 0.0   ;;  %vm250_vm0 = vmmov 0   ;;  %v173_v1 = vld [vmem:[#allocation6 + $0x8] sm:$0xff]   ;;  %v174_v2 = vld [vmem:[#allocation6] sm:$0xff]  }
  0x1b   :  { %158 = vmatprep.subr.bf16.mxu0 %v249_v0  ;;  %162 = vmatprep.mubr.msk.bf16.mxu0 %vm250_vm0, %v249_v0  ;;  %v47_v3 = vld [vmem:[#allocation3] sm:$0xff]  ;;  %vm66_vm1 = vcmask 261120   ;;  %s251_s1 = smov [#allocation8]   ;;  %vm133_vm2 = vcmask 130048  }
  0x1c   :  { %159 = vmatpush3.bf16.msra.mxu0 %v173_v1  ;;  %v48_v4 = vpack.c.bf16 %v47_v3, %v47_v3  ;;  %v154_v5 = vld [vmem:[%s286_s2] ss:$0 sm:$0xff]  ;;  %s141_s25 = sshll.u32 %s251_s1, 4  ;;  %s142_s25 = int_to_ptr.vmem [resolvable:$true] %s141_s25 }
  0x1d   :  { %160 = vmatprep.subr.bf16.mxu0 %v249_v0  ;;  %s219_s2 = scalar_lea.vmem %s142_s25, 128  ;;  %p224_p11 = scmp.lt.s32.totalorder %s142_s25, %s142_s25 }
  0x1e   :  { %p220_p10 = scmp.ne.s32.totalorder %s142_s25, %s219_s2  ;;  %p225_p12 = scmp.lt.s32.totalorder %s219_s2, %s219_s2 }
  0x20   :  { %161 = vmatpush3.bf16.msra.mxu0 %v174_v2  ;;  %p226_p13 = por %p225_p12, %p224_p11 }
  0x22   :  { %p227_p0 = pnand %p226_p13, %p220_p10 }
  0x23   :  { %163 = vmatmul.mubr.msk.bf16.vlgmr.msra.gmra.mxu0 %vm66_vm1, %v48_v4 }
  0xe3   :  { %v104_v6 = vpop.f32.mrf.mxu0 }
  0xe4   :  { %v123_v7 = vadd.f32 %v154_v5, %v104_v6 }
  0xe5   :  { %v164_v8 = vpop.f32.mrf.mxu0 }
  0xe6   :  { %124 = vmax.xlane.f32.xlu0 %v123_v7 }
  0xe7   :  { %v107_v9 = vpop.f32.mrf.mxu0 }
  0xe9   :  { %v165_v10 = vpop.f32.mrf.mxu0 }
 0x16f   :  { %v125_v11 = vpop.xlane.xlu0 %124 }
 0x170   :  { %v126_v12 = vsub.f32 %v123_v7, %v125_v11 }
 0x172   :  { %v127_v13 = vmul.f32 1.442695, %v126_v12 }
 0x174   :  { %175 = vpow2.f32 %v127_v13 }
 0x181   :  { %v176_v14 = vpop.eup %175 }
 0x182   :  { %129 = vadd.xlane.f32.xlu0 %v176_v14 }
 0x20b   :  { %v130_v15 = vpop.xlane.xlu0 %129 }
 0x20c   :  { %177 = vrcp.f32 %v130_v15 }
 0x219   :  { %v178_v16 = vpop.eup %177 }
 0x21a   :  { %v132_v17 = vmul.f32 %v178_v16, %v176_v14 }
 0x21c   :  { %134 = vst.msk [vmem:[#allocation8] sm:$0xff] %vm133_vm2, %v132_v17 }
 0x21d   :  { %230 = shalt.err (!%p227_p0)
}
 0x21e   :  { %144 = dma.vmem_to_hbm [thread:$0]  %s142_s25, 128, %s287_s3, [#allocation5]  }
 0x21f   :  { %243 = dma.done.wait [#allocation5], 128  }
 0x220   :  { %244 = vsyncadd [#allocation5], 4294967168 }
 0x221   :  { %148 = vsyncpa [#allocation4], 1 }
 0x222   :  { %149 = vsyncpa [#allocation7], 1 }
 0x223   :  { %150 = vsyncpa [#allocation5], 1 }

</bundles_post_ra>
